<compile_context>
chip_gen: v7x
topology: tpu7x:2x2x1
jax: 0.10.0
libtpu: 0.0.40
codegen_flags: <defaults>
</compile_context>

<pallas_src>
import functools

import jax
import jax.numpy as jnp
from jax import lax
from jax.experimental import pallas as pl
from jax.experimental.pallas import tpu as pltpu

NEG_INF = -1e30


def _round8(n):
    return ((n + 7) // 8) * 8


def _param_layout(in_feats, heads, hid_feats, out_feats):
    """Row offsets of each parameter inside the packed (rows, H*C1) slab.

    Every entry starts on an 8-row (sublane-tile) boundary so all in-kernel
    static slices are tile-aligned.
    """
    hc1 = heads * hid_feats
    lay, r = {}, 0
    lay["w1"] = r;    r += _round8(in_feats)   # (in_feats, H*C1)
    lay["a1s"] = r;   r += _round8(heads)      # (H, H*C1) block layout
    lay["a1d"] = r;   r += _round8(heads)      # (H, H*C1) block layout
    lay["hmask"] = r; r += _round8(heads)      # (H, H*C1) head-diagonal mask
    lay["b1"] = r;    r += 8                   # (1, H*C1)
    lay["w2"] = r;    r += _round8(hc1)        # (H*C1, out_feats) in cols 0:C2
    lay["a2s"] = r;   r += 8                   # (1, out_feats)
    lay["a2d"] = r;   r += 8                   # (1, out_feats)
    lay["b2"] = r;    r += 8                   # (1, out_feats)
    lay["rows"], lay["cols"] = r, hc1
    return lay


def pack_params(W1_all, a1_src, a1_dst, b1, W2, a2_src, a2_dst, b2,
                in_feats, heads, hid_feats, out_feats):
    """Pack all parameters into one lane-dense f32 slab (single DMA)."""
    lay = _param_layout(in_feats, heads, hid_feats, out_feats)
    hc1 = heads * hid_feats
    assert out_feats <= hc1, "packing assumes out_feats <= heads*hid_feats"
    eye = jnp.eye(heads, dtype=jnp.float32)
    # Row h carries head h's attention vector in its own column block.
    a1s_bd = (eye[:, :, None] * a1_src[:, None, :]).reshape(heads, hc1)
    a1d_bd = (eye[:, :, None] * a1_dst[:, None, :]).reshape(heads, hc1)
    hmask = jnp.repeat(eye, hid_feats, axis=1)            # (H, H*C1)

    p = jnp.zeros((lay["rows"], lay["cols"]), jnp.float32)
    p = p.at[lay["w1"]:lay["w1"] + in_feats, :].set(W1_all)
    p = p.at[lay["a1s"]:lay["a1s"] + heads, :].set(a1s_bd)
    p = p.at[lay["a1d"]:lay["a1d"] + heads, :].set(a1d_bd)
    p = p.at[lay["hmask"]:lay["hmask"] + heads, :].set(hmask)
    p = p.at[lay["b1"], :].set(b1.reshape(-1))
    p = p.at[lay["w2"]:lay["w2"] + hc1, 0:out_feats].set(W2)
    p = p.at[lay["a2s"], 0:out_feats].set(a2_src.reshape(-1))
    p = p.at[lay["a2d"], 0:out_feats].set(a2_dst.reshape(-1))
    p = p.at[lay["b2"], 0:out_feats].set(b2.reshape(-1))
    return p


def _gat_forward_kernel(x_ref, adj_ref, p_ref, o_ref, *,
                        in_feats, heads, hid_feats, out_feats, lay):
    N = x_ref.shape[0]
    H, C1, C2 = heads, hid_feats, out_feats
    HC1 = H * C1

    x = x_ref[...]                              # (N, Fin)
    adj = adj_ref[...]                          # (N, N), adj[dst, src]

    # Additive mask, computed once and reused by both layers.
    mask_add = jnp.where(adj > 0.0, 0.0, NEG_INF)          # (N, N)

    # ---- packed parameters (static, 8-aligned slices) ------------------------
    w1 = p_ref[lay["w1"]:lay["w1"] + in_feats, :]          # (Fin, H*C1)
    a1s_bd = p_ref[lay["a1s"]:lay["a1s"] + H, :]           # (H, H*C1)
    a1d_bd = p_ref[lay["a1d"]:lay["a1d"] + H, :]           # (H, H*C1)
    hmask = p_ref[lay["hmask"]:lay["hmask"] + H, :]        # (H, H*C1)
    b1 = p_ref[lay["b1"]:lay["b1"] + 1, :]                 # (1, H*C1)
    w2 = p_ref[lay["w2"]:lay["w2"] + HC1, 0:C2]            # (H*C1, C2)
    a2s = p_ref[lay["a2s"]:lay["a2s"] + 1, 0:C2]           # (1, C2)
    a2d = p_ref[lay["a2d"]:lay["a2d"] + 1, 0:C2]           # (1, C2)
    b2 = p_ref[lay["b2"]:lay["b2"] + 1, 0:C2]              # (1, C2)

    # ---- layer 1: all 8 heads batched --------------------------------------
    h_all = jnp.dot(x, w1, preferred_element_type=jnp.float32)     # (N, H*C1)

    # Per-head score projections as two (H, N) MXU matmuls.
    e_src = lax.dot_general(a1s_bd, h_all, (((1,), (1,)), ((), ())),
                            preferred_element_type=jnp.float32)    # (H, N)
    e_dst = lax.dot_general(a1d_bd, h_all, (((1,), (1,)), ((), ())),
                            preferred_element_type=jnp.float32)    # (H, N)

    # Scores for all heads at once: s[h, dst, src] = e_dst[h,dst] + e_src[h,src]
    s = e_dst[:, :, None] + e_src[:, None, :]                      # (H, N, N)
    s = jnp.where(s >= 0, s, 0.2 * s)                              # LeakyReLU(0.2)
    s = s + mask_add[None, :, :]

    # ONE fused masked softmax over the src axis for all heads.
    s = s - jnp.max(s, axis=-1, keepdims=True)
    p = jnp.exp(s)
    alpha = p * pl.reciprocal(jnp.sum(p, axis=-1, keepdims=True), approx=True)

    # All-head aggregation with a single MXU matmul:
    #   Y[h*N+dst, j] = sum_src alpha[h,dst,src] * h_all[src, j]
    # then keep only head h's own column block via the head mask.
    y = jnp.dot(alpha.reshape(H * N, N), h_all,
                preferred_element_type=jnp.float32)                # (H*N, H*C1)
    out_all = jnp.sum(y.reshape(H, N, HC1) * hmask[:, None, :], axis=0)  # (N, H*C1)

    # concat -> bias -> inter-layer leaky_relu(0.01), materialized once (~2 KiB)
    out_all = out_all + b1
    out_all = jnp.where(out_all >= 0, out_all, 0.01 * out_all)

    # ---- layer 2: single head, concat=False (mean over 1 head == identity) --
    h2 = jnp.dot(out_all, w2, preferred_element_type=jnp.float32)  # (N, C2)
    e_dst2 = lax.dot_general(h2, a2d, (((1,), (1,)), ((), ())),
                             preferred_element_type=jnp.float32)   # (N, 1)
    e_src2 = lax.dot_general(a2s, h2, (((1,), (1,)), ((), ())),
                             preferred_element_type=jnp.float32)   # (1, N)
    s2 = e_dst2 + e_src2
    s2 = jnp.where(s2 >= 0, s2, 0.2 * s2)                          # LeakyReLU(0.2)
    s2 = s2 + mask_add
    s2 = s2 - jnp.max(s2, axis=-1, keepdims=True)
    p2 = jnp.exp(s2)
    alpha2 = p2 * pl.reciprocal(jnp.sum(p2, axis=-1, keepdims=True), approx=True)
    o_ref[...] = (jnp.dot(alpha2, h2, preferred_element_type=jnp.float32) + b2)


def gat_forward(x, adj, params, *, in_feats, heads, hid_feats, out_feats):
    """Full GAT forward in one grid-less pallas_call (everything in VMEM)."""
    N = x.shape[0]
    lay = _param_layout(in_feats, heads, hid_feats, out_feats)
    kern = functools.partial(_gat_forward_kernel, in_feats=in_feats, heads=heads,
                             hid_feats=hid_feats, out_feats=out_feats, lay=lay)
    vmem = pl.BlockSpec(memory_space=pltpu.MemorySpace.VMEM)
    return pl.pallas_call(
        kern,
        out_shape=jax.ShapeDtypeStruct((N, out_feats), jnp.float32),
        in_specs=[vmem, vmem, vmem],
        out_specs=vmem,
    )(x, adj, params)


if __name__ == "__main__":
    # Hyperparameters consistent with the module.
    in_feats, hid_feats, out_feats, heads = 8, 4, 16, 8
    N, G = 16, 2                              # 16 nodes, 2 graph components

    key = jax.random.PRNGKey(0)
    ks = jax.random.split(key, 8)

    def glorot(k, shape):
        a = (6.0 / (shape[-2] + shape[-1])) ** 0.5
        return jax.random.uniform(k, shape, jnp.float32, -a, a)

    # Node features.
    x = jax.random.normal(ks[0], (N, in_feats), jnp.float32)

    # Deterministic graph: per-component ring (both directions) + one chord.
    src_list, dst_list = [], []
    for gi in range(G):
        base, n_g = gi * (N // G), N // G
        for i in range(n_g):
            s0, d0 = base + i, base + (i + 1) % n_g
            src_list += [s0, d0]
            dst_list += [d0, s0]
        src_list += [base, base + n_g // 2]
        dst_list += [base + n_g // 2, base]
    edge_index = jnp.array([src_list, dst_list], dtype=jnp.int32)

    # Dense adjacency mask adj[dst, src] with self-loops (add_self_loops=True).
    adj = jnp.zeros((N, N), jnp.float32).at[edge_index[1], edge_index[0]].set(1.0)
    adj = adj.at[jnp.arange(N), jnp.arange(N)].set(1.0)

    # --- GATConv 1 parameters (heads=8, concat=True) -------------------------
    W1_heads = glorot(ks[1], (heads, in_feats, hid_feats))        # per-head W
    # Stack lane-dense: column block h of W1_all is head h's weight matrix.
    W1_all = W1_heads.transpose(1, 0, 2).reshape(in_feats, heads * hid_feats)
    a1_src = glorot(ks[2], (heads, hid_feats))
    a1_dst = glorot(ks[3], (heads, hid_feats))
    b1 = jnp.zeros((heads * hid_feats,), jnp.float32)

    # --- GATConv 2 parameters (heads=1, concat=False) ------------------------
    W2 = glorot(ks[4], (heads * hid_feats, out_feats))
    a2_src = glorot(ks[5], (1, out_feats))
    a2_dst = glorot(ks[6], (1, out_feats))
    b2 = jnp.zeros((out_feats,), jnp.float32)

    params = pack_params(W1_all, a1_src, a1_dst, b1, W2, a2_src, a2_dst, b2,
                         in_feats, heads, hid_feats, out_feats)

    fwd = jax.jit(lambda x_, adj_, p_: gat_forward(
        x_, adj_, p_, in_feats=in_feats, heads=heads,
        hid_feats=hid_feats, out_feats=out_feats))
    out = jax.block_until_ready(fwd(x, adj, params))

    assert out.shape == (N, out_feats), out.shape
    assert bool(jnp.all(jnp.isfinite(out)))
    print("KERNEL_OK")
</pallas_src>

<mosaic_0001>
module attributes {stable_mosaic.version = 11 : i64} {
  func.func @_gat_forward_kernel(%arg0: memref<16x8xf32, #tpu.memory_space<vmem>>, %arg1: memref<16x16xf32, #tpu.memory_space<vmem>>, %arg2: memref<96x32xf32, #tpu.memory_space<vmem>>, %arg3: memref<16x16xf32, #tpu.memory_space<vmem>>) attributes {dimension_semantics = [], scalar_prefetch = 0 : i64, scratch_operands = 0 : i64, tpu.core_type = #tpu.core_type<tc>} {
    %c0 = arith.constant 0 : index
    %c0_0 = arith.constant 0 : index
    %0 = vector.load %arg0[%c0, %c0_0] : memref<16x8xf32, #tpu.memory_space<vmem>>, vector<16x8xf32>
    %c0_1 = arith.constant 0 : index
    %c0_2 = arith.constant 0 : index
    %1 = vector.load %arg1[%c0_1, %c0_2] : memref<16x16xf32, #tpu.memory_space<vmem>>, vector<16x16xf32>
    %cst = arith.constant 0.000000e+00 : f32
    %2 = vector.broadcast %cst : f32 to vector<16x16xf32>
    %3 = arith.cmpf ogt, %1, %2 : vector<16x16xf32>
    %cst_3 = arith.constant 0.000000e+00 : f32
    %cst_4 = arith.constant -1.000000e+30 : f32
    %4 = vector.broadcast %cst_3 : f32 to vector<16x16xf32>
    %5 = vector.broadcast %cst_4 : f32 to vector<16x16xf32>
    %6 = arith.select %3, %4, %5 : vector<16x16xi1>, vector<16x16xf32>
    %c0_5 = arith.constant 0 : index
    %c0_6 = arith.constant 0 : index
    %7 = vector.load %arg2[%c0_5, %c0_6] : memref<96x32xf32, #tpu.memory_space<vmem>>, vector<8x32xf32>
    %c8 = arith.constant 8 : index
    %c0_7 = arith.constant 0 : index
    %8 = vector.load %arg2[%c8, %c0_7] : memref<96x32xf32, #tpu.memory_space<vmem>>, vector<8x32xf32>
    %c16 = arith.constant 16 : index
    %c0_8 = arith.constant 0 : index
    %9 = vector.load %arg2[%c16, %c0_8] : memref<96x32xf32, #tpu.memory_space<vmem>>, vector<8x32xf32>
    %c24 = arith.constant 24 : index
    %c0_9 = arith.constant 0 : index
    %10 = vector.load %arg2[%c24, %c0_9] : memref<96x32xf32, #tpu.memory_space<vmem>>, vector<8x32xf32>
    %c32 = arith.constant 32 : index
    %c0_10 = arith.constant 0 : index
    %11 = vector.load %arg2[%c32, %c0_10] : memref<96x32xf32, #tpu.memory_space<vmem>>, vector<1x32xf32>
    %c40 = arith.constant 40 : index
    %c0_11 = arith.constant 0 : index
    %12 = vector.load %arg2[%c40, %c0_11] : memref<96x32xf32, #tpu.memory_space<vmem>>, vector<32x16xf32>
    %c72 = arith.constant 72 : index
    %c0_12 = arith.constant 0 : index
    %13 = vector.load %arg2[%c72, %c0_12] : memref<96x32xf32, #tpu.memory_space<vmem>>, vector<1x16xf32>
    %c80 = arith.constant 80 : index
    %c0_13 = arith.constant 0 : index
    %14 = vector.load %arg2[%c80, %c0_13] : memref<96x32xf32, #tpu.memory_space<vmem>>, vector<1x16xf32>
    %c88 = arith.constant 88 : index
    %c0_14 = arith.constant 0 : index
    %15 = vector.load %arg2[%c88, %c0_14] : memref<96x32xf32, #tpu.memory_space<vmem>>, vector<1x16xf32>
    %cst_15 = arith.constant dense<0.000000e+00> : vector<16x32xf32>
    %16 = tpu.matmul %0, %7, %cst_15 {dimension_numbers = #tpu.dot_dimension_numbers<[1], [0], [0], [1], [0, 0, 1, 1], [], []>} : vector<16x8xf32>, vector<8x32xf32>, vector<16x32xf32> -> vector<16x32xf32>
    %cst_16 = arith.constant dense<0.000000e+00> : vector<8x16xf32>
    %17 = tpu.matmul %8, %16, %cst_16 {dimension_numbers = #tpu.dot_dimension_numbers<[1], [1], [0], [0], [0, 0, 1, 0], [], []>} : vector<8x32xf32>, vector<16x32xf32>, vector<8x16xf32> -> vector<8x16xf32>
    %cst_17 = arith.constant dense<0.000000e+00> : vector<8x16xf32>
    %18 = tpu.matmul %9, %16, %cst_17 {dimension_numbers = #tpu.dot_dimension_numbers<[1], [1], [0], [0], [0, 0, 1, 0], [], []>} : vector<8x32xf32>, vector<16x32xf32>, vector<8x16xf32> -> vector<8x16xf32>
    %19 = vector.shape_cast %18 : vector<8x16xf32> to vector<8x16x1xf32>
    %20 = vector.shape_cast %17 : vector<8x16xf32> to vector<8x1x16xf32>
    %21 = vector.broadcast %19 : vector<8x16x1xf32> to vector<8x16x16xf32>
    %22 = vector.broadcast %20 : vector<8x1x16xf32> to vector<8x16x16xf32>
    %23 = arith.addf %21, %22 : vector<8x16x16xf32>
    %cst_18 = arith.constant 0.000000e+00 : f32
    %24 = vector.broadcast %cst_18 : f32 to vector<8x16x16xf32>
    %25 = arith.cmpf oge, %23, %24 : vector<8x16x16xf32>
    %cst_19 = arith.constant 2.000000e-01 : f32
    %26 = vector.broadcast %cst_19 : f32 to vector<8x16x16xf32>
    %27 = arith.mulf %26, %23 : vector<8x16x16xf32>
    %28 = arith.select %25, %23, %27 : vector<8x16x16xi1>, vector<8x16x16xf32>
    %29 = vector.shape_cast %6 : vector<16x16xf32> to vector<1x16x16xf32>
    %30 = vector.broadcast %29 : vector<1x16x16xf32> to vector<8x16x16xf32>
    %31 = arith.addf %28, %30 : vector<8x16x16xf32>
    %cst_20 = arith.constant dense<0xFF800000> : vector<8x16xf32>
    %32 = vector.multi_reduction <maximumf>, %31, %cst_20 [2] : vector<8x16x16xf32> to vector<8x16xf32>
    %33 = vector.shape_cast %32 : vector<8x16xf32> to vector<8x16x1xf32>
    %34 = vector.broadcast %33 : vector<8x16x1xf32> to vector<8x16x16xf32>
    %35 = arith.subf %31, %34 : vector<8x16x16xf32>
    %36 = math.exp %35 : vector<8x16x16xf32>
    %cst_21 = arith.constant dense<0.000000e+00> : vector<8x16xf32>
    %37 = vector.multi_reduction <add>, %36, %cst_21 [2] : vector<8x16x16xf32> to vector<8x16xf32>
    %38 = vector.shape_cast %37 : vector<8x16xf32> to vector<8x16x1xf32>
    %39 = tpu.reciprocal %38 {approx = true} : vector<8x16x1xf32> -> vector<8x16x1xf32>
    %40 = vector.broadcast %39 : vector<8x16x1xf32> to vector<8x16x16xf32>
    %41 = arith.mulf %36, %40 : vector<8x16x16xf32>
    %42 = vector.shape_cast %41 : vector<8x16x16xf32> to vector<128x16xf32>
    %cst_22 = arith.constant dense<0.000000e+00> : vector<128x32xf32>
    %43 = tpu.matmul %42, %16, %cst_22 {dimension_numbers = #tpu.dot_dimension_numbers<[1], [0], [0], [1], [0, 0, 1, 1], [], []>} : vector<128x16xf32>, vector<16x32xf32>, vector<128x32xf32> -> vector<128x32xf32>
    %44 = vector.shape_cast %43 : vector<128x32xf32> to vector<8x16x32xf32>
    %45 = vector.shape_cast %10 : vector<8x32xf32> to vector<8x1x32xf32>
    %46 = vector.broadcast %45 : vector<8x1x32xf32> to vector<8x16x32xf32>
    %47 = arith.mulf %44, %46 : vector<8x16x32xf32>
    %cst_23 = arith.constant dense<0.000000e+00> : vector<16x32xf32>
    %48 = vector.multi_reduction <add>, %47, %cst_23 [0] : vector<8x16x32xf32> to vector<16x32xf32>
    %49 = vector.broadcast %11 : vector<1x32xf32> to vector<16x32xf32>
    %50 = arith.addf %48, %49 : vector<16x32xf32>
    %cst_24 = arith.constant 0.000000e+00 : f32
    %51 = vector.broadcast %cst_24 : f32 to vector<16x32xf32>
    %52 = arith.cmpf oge, %50, %51 : vector<16x32xf32>
    %cst_25 = arith.constant 0.00999999977 : f32
    %53 = vector.broadcast %cst_25 : f32 to vector<16x32xf32>
    %54 = arith.mulf %53, %50 : vector<16x32xf32>
    %55 = arith.select %52, %50, %54 : vector<16x32xi1>, vector<16x32xf32>
    %cst_26 = arith.constant dense<0.000000e+00> : vector<16x16xf32>
    %56 = tpu.matmul %55, %12, %cst_26 {dimension_numbers = #tpu.dot_dimension_numbers<[1], [0], [0], [1], [0, 0, 1, 1], [], []>} : vector<16x32xf32>, vector<32x16xf32>, vector<16x16xf32> -> vector<16x16xf32>
    %cst_27 = arith.constant dense<0.000000e+00> : vector<16x1xf32>
    %57 = tpu.matmul %56, %14, %cst_27 {dimension_numbers = #tpu.dot_dimension_numbers<[1], [1], [0], [0], [0, 0, 1, 0], [], []>} : vector<16x16xf32>, vector<1x16xf32>, vector<16x1xf32> -> vector<16x1xf32>
    %cst_28 = arith.constant dense<0.000000e+00> : vector<1x16xf32>
    %58 = tpu.matmul %13, %56, %cst_28 {dimension_numbers = #tpu.dot_dimension_numbers<[1], [1], [0], [0], [0, 0, 1, 0], [], []>} : vector<1x16xf32>, vector<16x16xf32>, vector<1x16xf32> -> vector<1x16xf32>
    %59 = vector.broadcast %57 : vector<16x1xf32> to vector<16x16xf32>
    %60 = vector.broadcast %58 : vector<1x16xf32> to vector<16x16xf32>
    %61 = arith.addf %59, %60 : vector<16x16xf32>
    %cst_29 = arith.constant 0.000000e+00 : f32
    %62 = vector.broadcast %cst_29 : f32 to vector<16x16xf32>
    %63 = arith.cmpf oge, %61, %62 : vector<16x16xf32>
    %cst_30 = arith.constant 2.000000e-01 : f32
    %64 = vector.broadcast %cst_30 : f32 to vector<16x16xf32>
    %65 = arith.mulf %64, %61 : vector<16x16xf32>
    %66 = arith.select %63, %61, %65 : vector<16x16xi1>, vector<16x16xf32>
    %67 = arith.addf %66, %6 : vector<16x16xf32>
    %cst_31 = arith.constant dense<0xFF800000> : vector<16xf32>
    %68 = vector.multi_reduction <maximumf>, %67, %cst_31 [1] : vector<16x16xf32> to vector<16xf32>
    %69 = vector.shape_cast %68 : vector<16xf32> to vector<16x1xf32>
    %70 = vector.broadcast %69 : vector<16x1xf32> to vector<16x16xf32>
    %71 = arith.subf %67, %70 : vector<16x16xf32>
    %72 = math.exp %71 : vector<16x16xf32>
    %cst_32 = arith.constant dense<0.000000e+00> : vector<16xf32>
    %73 = vector.multi_reduction <add>, %72, %cst_32 [1] : vector<16x16xf32> to vector<16xf32>
    %74 = vector.shape_cast %73 : vector<16xf32> to vector<16x1xf32>
    %75 = tpu.reciprocal %74 {approx = true} : vector<16x1xf32> -> vector<16x1xf32>
    %76 = vector.broadcast %75 : vector<16x1xf32> to vector<16x16xf32>
    %77 = arith.mulf %72, %76 : vector<16x16xf32>
    %cst_33 = arith.constant dense<0.000000e+00> : vector<16x16xf32>
    %78 = tpu.matmul %77, %56, %cst_33 {dimension_numbers = #tpu.dot_dimension_numbers<[1], [0], [0], [1], [0, 0, 1, 1], [], []>} : vector<16x16xf32>, vector<16x16xf32>, vector<16x16xf32> -> vector<16x16xf32>
    %79 = vector.broadcast %15 : vector<1x16xf32> to vector<16x16xf32>
    %80 = arith.addf %78, %79 : vector<16x16xf32>
    %c0_34 = arith.constant 0 : index
    %c0_35 = arith.constant 0 : index
    %81 = vector.load %arg3[%c0_34, %c0_35] : memref<16x16xf32, #tpu.memory_space<vmem>>, vector<16x16xf32>
    tpu.vector_store %arg3[%c0_34, %c0_35], %80 {strides = array<i32>} : memref<16x16xf32, #tpu.memory_space<vmem>>, vector<16x16xf32>,
    return
  }
}

</mosaic_0001>

<bundles_post_ra>
// kernel: _lambda_.1
= control target key start
LH: loop header
LB: loop body
LE: loop exit
PB: predicated region body
PF: predicated region fallthrough
CT: control target
= control target key end

     0   :  { %vm35_vm0 = vcmask 64512   ;;  %s2010_s0 = inlined_call_operand.vmem [shape: f32[16,8], index: 0, kind: input, shape index: {}]   ;;  %s2011_s1 = inlined_call_operand.vmem [shape: f32[16,16], index: 1, kind: input, shape index: {}]   ;;  %s2012_s2 = inlined_call_operand.vmem [shape: f32[96,32], index: 2, kind: input, shape index: {}]   ;;  %s2013_s3 = inlined_call_operand.hbm [shape: f32[16,16], index: 3, kind: output, shape index: {}]  }
   0x1   :  { %v23_v0 = vld [vmem:[%s2012_s2] sm:$0xff]  ;;  %v16_v2 = vld [vmem:[%s2010_s0 + $0x8] sm:$0xff] }
   0x2   :  { %v15_v1 = vld [vmem:[%s2010_s0] sm:$0xff]  ;;  %1431 = vmatprep.subr.mxu1 %v23_v0 }
   0x3   :  { %1433 = vmatprep.mubr.msk.f32.mxu1 %vm35_vm0, %v15_v1 }
   0x4   :  { %8 = vsyncpa [#allocation3], 0  ;;  %1432 = vmatpush3.msra.mxu1 %v23_v0  ;;  %v1636_v3 = vmov 0.0|0.0   ;;  %vm1637_vm1 = vmmov 0   ;;  %v1638_v4 = vmov 0.0   ;;  %vm117_vm2 = vcmask 261120  }
   0x5   :  { %1434 = vmatmul.mubr.msk.f32.vlgmr.msra.gmra.mrb[0].mxu1 %vm35_vm0, %v16_v2  ;;  %1503 = vmatprep.subr.bf16.mxu0 %v1636_v3  ;;  %vm1505_vm3 = vmpackc.low %vm117_vm2, %vm117_vm2  ;;  %v24_v8 = vld [vmem:[%s2012_s2 + $0x8] sm:$0xff]  ;;  %v25_v9 = vld [vmem:[%s2012_s2 + $0x10] sm:$0xff]  ;;  %v270_v10 = vlaneseq  ;;  %v1639_v32 = vmov 1966171168   ;;  %v1640_v50 = vmov -1e+30  }
   0x6   :  { %1440 = vmatprep.mubr.msk.f32.mxu0 %vm1637_vm1, %v1638_v4  ;;  %v361_v33 = vunpack.c.l.s4 %v1639_v32  ;;  %v17_v40 = vld [vmem:[%s2011_s1] sm:$0xff]  ;;  %v18_v43 = vld [vmem:[%s2011_s1 + $0x8] sm:$0xff]  ;;  %vm528_vm8 = vcmask 130048   ;;  %s1641_s15 = smov [#allocation2]  }
   0x7   :  { %v271_v13 = vshrl.u32 %v270_v10, 7  ;;  %vm19_vm4 = vcmp.gt.f32.partialorder %v17_v40, 0.0  ;;  %vm20_vm5 = vcmp.gt.f32.partialorder %v18_v43, 0.0  ;;  %s1346_s16 = sshll.u32 %s1641_s15, 4  ;;  %s1347_s16 = int_to_ptr.vmem [resolvable:$true] %s1346_s16 }
   0x8   :  { %v362_v34 = vunpack.c.0.s8 %v361_v33  ;;  %v1710_v51 = vsel %vm19_vm4, 0.0, %v1640_v50  ;;  %v1718_v0 = vsel %vm20_vm5, 0.0, %v1640_v50  ;;  %s1612_s17 = scalar_lea.vmem %s1347_s16, 256  ;;  %p1617_p1 = scmp.lt.s32.totalorder %s1347_s16, %s1347_s16 }
   0x9   :  { %v283_v14 = vsub.s32 1, %v271_v13  ;;  %v1691_v15 = vsub.s32 0, %v271_v13  ;;  %v294_v20 = vsub.s32 2, %v271_v13  ;;  %v305_v22 = vsub.s32 3, %v271_v13  ;;  %p1613_p0 = scmp.ne.s32.totalorder %s1347_s16, %s1612_s17  ;;  %p1618_p2 = scmp.lt.s32.totalorder %s1612_s17, %s1612_s17 }
   0xa   :  { %v316_v24 = vsub.s32 4, %v271_v13  ;;  %v327_v26 = vsub.s32 5, %v271_v13  ;;  %v338_v28 = vsub.s32 6, %v271_v13  ;;  %v349_v30 = vsub.s32 7, %v271_v13 }
   0xb   :  { %v1694_v35 = vsub.s32 %v362_v34, %v271_v13  ;;  %p1619_p3 = por %p1618_p2, %p1617_p1 }
   0xd   :  { %p1620_p4 = pnand %p1619_p3, %p1613_p0 }
  0xd8   :  { %v1435_v5 = vpop.f32.mrb[0].mxu1 }
  0xd9   :  { %v108_v6 = vpop.f32.mrb[1].mxu1 }
  0xda   :  { %v1504_v7 = vpack.c.bf16 %v1435_v5, %v108_v6 }
  0xdc   :  { %1506 = vmatpush3.bf16.xpose.msk.msra.mxu0 %vm1505_vm3, %v1504_v7  ;;  %1512 = vmatprep.subr.bf16.mxu1 %v1504_v7 }
  0xdd   :  { %1514 = vmatpush3.bf16.msra.mxu1 %v1504_v7  ;;  %1507 = vmatprep.subr.bf16.mxu0 %v1636_v3 }
  0xe3   :  { %1441 = vmatmul.mubr.msk.f32.vlgmr.msra.gmra.mrb[0].mxu0 %vm117_vm2, %v24_v8 }
  0xe4   :  { %1510 = vmatpush3.bf16.xpose.msk.msra.mxu0 %vm1505_vm3, %v1504_v7  ;;  %1447 = vmatprep.mubr.msk.f32.mxu0 %vm1637_vm1, %v1638_v4 }
  0xeb   :  { %1448 = vmatmul.mubr.msk.f32.vlgmr.msra.gmra.mrb[2].mxu0 %vm117_vm2, %v25_v9 }
 0x1b6   :  { %v1689_v11 = vpop.f32.mrb[0].mxu0 }
 0x1b7   :  { %v1442_v12 = vpop.f32.mrb[1].mxu0  ;;  %v366_v36 = vrot.slane %v1689_v11, %v1694_v35  ;;  %v359_v44 = vcombine.high %v1689_v11, %v1689_v11 }
 0x1b9   :  { %v374_v37 = vcombine.high %v366_v36, %v366_v36  ;;  %v382_v38 = vrot.slane %v366_v36, %v1694_v35  ;;  %v373_v54 = vrot.slane %v359_v44, %v1694_v35 }
 0x1bb   :  { %v396_v39 = vrot.slane %v374_v37, %v1694_v35  ;;  %v411_v42 = vrot.slane %v382_v38, %v1691_v15  ;;  %v404_v49 = vcombine.high %v382_v38, %v382_v38  ;;  %v375_v13 = vcombine.high %v373_v54, %v373_v54 }
 0x1bd   :  { %v415_v41 = vrot.slane %v396_v39, %v1691_v15  ;;  %v419_v61 = vrot.slane %v404_v49, %v1691_v15  ;;  %v406_v63 = vcombine.high %v396_v39, %v396_v39 }
 0x1be   :  { %v266_v16 = vpop.f32.mrb[2].mxu0 }
 0x1bf   :  { %v1449_v17 = vpop.f32.mrb[3].mxu0  ;;  %v284_v18 = vrot.slane %v266_v16, %v283_v14  ;;  %v273_v19 = vrot.slane %v266_v16, %v1691_v15  ;;  %v295_v21 = vrot.slane %v266_v16, %v294_v20  ;;  %v306_v23 = vrot.slane %v266_v16, %v305_v22 }
 0x1c0   :  { %v317_v25 = vrot.slane %v266_v16, %v316_v24  ;;  %v328_v27 = vrot.slane %v266_v16, %v327_v26  ;;  %v339_v29 = vrot.slane %v266_v16, %v338_v28  ;;  %v350_v31 = vrot.slane %v266_v16, %v349_v30 }
 0x1c1   :  { %286 = vbcast.lane.b32.xlu1 %v284_v18, 256  ;;  %275 = vbcast.lane.b32.xlu0 %v273_v19, 256  ;;  %v423_v14 = vrot.slane %v406_v63, %v1691_v15  ;;  %v389_v17 = vrot.slane %v373_v54, %v1694_v35  ;;  %v403_v30 = vrot.slane %v375_v13, %v1694_v35 }
 0x1c3   :  { %v427_v28 = vrot.slane %v389_v17, %v1691_v15  ;;  %v431_v43 = vrot.slane %v403_v30, %v1691_v15 }
 0x1c5   :  { %290 = vbcast.lane.b32.xlu1 %v284_v18, 264  ;;  %279 = vbcast.lane.b32.xlu0 %v273_v19, 264 }
 0x1c9   :  { %301 = vbcast.lane.b32.xlu1 %v295_v21, 264  ;;  %297 = vbcast.lane.b32.xlu0 %v295_v21, 256 }
 0x1cd   :  { %312 = vbcast.lane.b32.xlu1 %v306_v23, 264  ;;  %308 = vbcast.lane.b32.xlu0 %v306_v23, 256 }
 0x1d1   :  { %323 = vbcast.lane.b32.xlu1 %v317_v25, 264  ;;  %319 = vbcast.lane.b32.xlu0 %v317_v25, 256 }
 0x1d5   :  { %334 = vbcast.lane.b32.xlu1 %v328_v27, 264  ;;  %330 = vbcast.lane.b32.xlu0 %v328_v27, 256 }
 0x1d9   :  { %345 = vbcast.lane.b32.xlu1 %v339_v29, 264  ;;  %341 = vbcast.lane.b32.xlu0 %v339_v29, 256 }
 0x1dd   :  { %356 = vbcast.lane.b32.xlu1 %v350_v31, 264  ;;  %352 = vbcast.lane.b32.xlu0 %v350_v31, 256 }
 0x233   :  { %v287_v45 = vpop.permute.xlu1 %286  ;;  %v276_v46 = vpop.permute.xlu0 %275 }
 0x234   :  { %v450_v47 = vadd.f32 %v415_v41, %v287_v45  ;;  %v448_v48 = vadd.f32 %v411_v42, %v276_v46  ;;  %v405_v45 = vcombine.high %v389_v17, %v389_v17 }
 0x236   :  { %vm466_vm6 = vcmp.ge.f32.partialorder %v450_v47, 0.0  ;;  %v482_v52 = vmul.f32 0.2, %v450_v47  ;;  %vm464_vm7 = vcmp.ge.f32.partialorder %v448_v48, 0.0  ;;  %v480_v53 = vmul.f32 0.2, %v448_v48 }
 0x237   :  { %v291_v55 = vpop.permute.xlu1 %290  ;;  %v280_v56 = vpop.permute.xlu0 %279 }
 0x238   :  { %v451_v57 = vadd.f32 %v415_v41, %v291_v55  ;;  %v449_v58 = vadd.f32 %v411_v42, %v280_v56  ;;  %v496_v59 = vsel %vm464_vm7, %v448_v48, %v480_v53  ;;  %v498_v60 = vsel %vm466_vm6, %v450_v47, %v482_v52 }
 0x239   :  { %v1715_v62 = vadd.f32 %v496_v59, %v1710_v51  ;;  %v1723_v8 = vadd.f32 %v498_v60, %v1710_v51  ;;  %v407_v60 = vcombine.high %v403_v30, %v403_v30 }
 0x23a   :  { %vm467_vm9 = vcmp.ge.f32.partialorder %v451_v57, 0.0  ;;  %v483_v1 = vmul.f32 0.2, %v451_v57  ;;  %vm465_vm10 = vcmp.ge.f32.partialorder %v449_v58, 0.0  ;;  %v481_v2 = vmul.f32 0.2, %v449_v58 }
 0x23b   :  { %v302_v5 = vpop.permute.xlu1 %301  ;;  %v298_v6 = vpop.permute.xlu0 %297  ;;  %v529_v7 = vsel %vm528_vm8, %v1715_v62, -inf  ;;  %v535_v22 = vsel %vm528_vm8, %v1723_v8, -inf  ;;  %v439_v13 = vrot.slane %v407_v60, %v1691_v15 }
 0x23c   :  { %v453_v9 = vadd.f32 %v419_v61, %v302_v5  ;;  %v452_v10 = vadd.f32 %v419_v61, %v298_v6  ;;  %530 = vmax.xlane.f32.xlu0 %v529_v7  ;;  %v497_v11 = vsel %vm465_vm10, %v449_v58, %v481_v2  ;;  %v499_v12 = vsel %vm467_vm9, %v451_v57, %v483_v1 }
 0x23d   :  { %v1727_v16 = vadd.f32 %v497_v11, %v1718_v0  ;;  %v1735_v24 = vadd.f32 %v499_v12, %v1718_v0  ;;  %v435_v58 = vrot.slane %v405_v45, %v1691_v15 }
 0x23e   :  { %vm469_vm11 = vcmp.ge.f32.partialorder %v453_v9, 0.0  ;;  %v485_v18 = vmul.f32 0.2, %v453_v9  ;;  %vm468_vm12 = vcmp.ge.f32.partialorder %v452_v10, 0.0  ;;  %v484_v19 = vmul.f32 0.2, %v452_v10 }
 0x23f   :  { %v313_v20 = vpop.permute.xlu1 %312  ;;  %v309_v21 = vpop.permute.xlu0 %308  ;;  %v532_v23 = vsel %vm528_vm8, %v1727_v16, -inf  ;;  %v538_v37 = vsel %vm528_vm8, %v1735_v24, -inf }
 0x240   :  { %v455_v25 = vadd.f32 %v423_v14, %v313_v20  ;;  %v454_v26 = vadd.f32 %v423_v14, %v309_v21  ;;  %536 = vmax.xlane.f32.xlu0 %v535_v22  ;;  %533 = vmax.xlane.f32.xlu1 %v532_v23  ;;  %v500_v27 = vsel %vm468_vm12, %v452_v10, %v484_v19  ;;  %vm1525_vm12 = vmpackc.low %vm528_vm8, %vm528_vm8 }
 0x241   :  { %v1739_v29 = vadd.f32 %v500_v27, %v1710_v51  ;;  %v501_v31 = vsel %vm469_vm11, %v453_v9, %v485_v18 }
 0x242   :  { %vm471_vm13 = vcmp.ge.f32.partialorder %v455_v25, 0.0  ;;  %v487_v32 = vmul.f32 0.2, %v455_v25  ;;  %vm470_vm14 = vcmp.ge.f32.partialorder %v454_v26, 0.0  ;;  %v486_v33 = vmul.f32 0.2, %v454_v26 }
 0x243   :  { %v324_v34 = vpop.permute.xlu1 %323  ;;  %v320_v36 = vpop.permute.xlu0 %319  ;;  %v541_v38 = vsel %vm528_vm8, %v1739_v29, -inf  ;;  %v1748_v39 = vadd.f32 %v501_v31, %v1718_v0 }
 0x244   :  { %v457_v40 = vadd.f32 %v427_v28, %v324_v34  ;;  %v456_v41 = vadd.f32 %v427_v28, %v320_v36  ;;  %539 = vmax.xlane.f32.xlu0 %v538_v37  ;;  %542 = vmax.xlane.f32.xlu1 %v541_v38  ;;  %v502_v42 = vsel %vm470_vm14, %v454_v26, %v486_v33 }
 0x245   :  { %v1752_v44 = vadd.f32 %v502_v42, %v1710_v51  ;;  %v503_v46 = vsel %vm471_vm13, %v455_v25, %v487_v32  ;;  %v544_v52 = vsel %vm528_vm8, %v1748_v39, -inf }
 0x246   :  { %vm473_vm15 = vcmp.ge.f32.partialorder %v457_v40, 0.0  ;;  %v489_v47 = vmul.f32 0.2, %v457_v40  ;;  %vm472_vm0 = vcmp.ge.f32.partialorder %v456_v41, 0.0  ;;  %v488_v48 = vmul.f32 0.2, %v456_v41 }
 0x247   :  { %v335_v49 = vpop.permute.xlu1 %334  ;;  %v331_v50 = vpop.permute.xlu0 %330  ;;  %v547_v53 = vsel %vm528_vm8, %v1752_v44, -inf  ;;  %v1760_v54 = vadd.f32 %v503_v46, %v1718_v0 }
 0x248   :  { %v459_v55 = vadd.f32 %v431_v43, %v335_v49  ;;  %v458_v56 = vadd.f32 %v431_v43, %v331_v50  ;;  %545 = vmax.xlane.f32.xlu0 %v544_v52  ;;  %548 = vmax.xlane.f32.xlu1 %v547_v53  ;;  %v504_v57 = vsel %vm472_vm0, %v456_v41, %v488_v48 }
 0x249   :  { %v1764_v59 = vadd.f32 %v504_v57, %v1710_v51  ;;  %v505_v61 = vsel %vm473_vm15, %v457_v40, %v489_v47  ;;  %v550_v6 = vsel %vm528_vm8, %v1760_v54, -inf }
 0x24a   :  { %vm475_vm3 = vcmp.ge.f32.partialorder %v459_v55, 0.0  ;;  %v491_v63 = vmul.f32 0.2, %v459_v55  ;;  %vm474_vm4 = vcmp.ge.f32.partialorder %v458_v56, 0.0  ;;  %v490_v1 = vmul.f32 0.2, %v458_v56 }
 0x24b   :  { %v346_v2 = vpop.permute.xlu1 %345  ;;  %v342_v5 = vpop.permute.xlu0 %341  ;;  %v553_v7 = vsel %vm528_vm8, %v1764_v59, -inf  ;;  %v1772_v9 = vadd.f32 %v505_v61, %v1718_v0 }
 0x24c   :  { %v461_v10 = vadd.f32 %v435_v58, %v346_v2  ;;  %v460_v11 = vadd.f32 %v435_v58, %v342_v5  ;;  %551 = vmax.xlane.f32.xlu0 %v550_v6  ;;  %554 = vmax.xlane.f32.xlu1 %v553_v7  ;;  %v506_v12 = vsel %vm474_vm4, %v458_v56, %v490_v1 }
 0x24d   :  { %v1776_v14 = vadd.f32 %v506_v12, %v1710_v51  ;;  %v507_v17 = vsel %vm475_vm3, %v459_v55, %v491_v63  ;;  %v556_v22 = vsel %vm528_vm8, %v1772_v9, -inf }
 0x24e   :  { %vm477_vm5 = vcmp.ge.f32.partialorder %v461_v10, 0.0  ;;  %v493_v18 = vmul.f32 0.2, %v461_v10  ;;  %vm476_vm6 = vcmp.ge.f32.partialorder %v460_v11, 0.0  ;;  %v492_v19 = vmul.f32 0.2, %v460_v11 }
 0x24f   :  { %v357_v20 = vpop.permute.xlu1 %356  ;;  %v353_v21 = vpop.permute.xlu0 %352  ;;  %v559_v23 = vsel %vm528_vm8, %v1776_v14, -inf  ;;  %v1784_v25 = vadd.f32 %v507_v17, %v1718_v0 }
 0x250   :  { %v463_v26 = vadd.f32 %v439_v13, %v357_v20  ;;  %v462_v27 = vadd.f32 %v439_v13, %v353_v21  ;;  %557 = vmax.xlane.f32.xlu0 %v556_v22  ;;  %560 = vmax.xlane.f32.xlu1 %v559_v23  ;;  %v508_v28 = vsel %vm476_vm6, %v460_v11, %v492_v19 }
 0x251   :  { %v1787_v30 = vadd.f32 %v508_v28, %v1710_v51  ;;  %v509_v31 = vsel %vm477_vm5, %v461_v10, %v493_v18  ;;  %v562_v34 = vsel %vm528_vm8, %v1784_v25, -inf }
 0x252   :  { %vm479_vm7 = vcmp.ge.f32.partialorder %v463_v26, 0.0  ;;  %v495_v32 = vmul.f32 0.2, %v463_v26  ;;  %vm478_vm9 = vcmp.ge.f32.partialorder %v462_v27, 0.0  ;;  %v494_v33 = vmul.f32 0.2, %v462_v27 }
 0x253   :  { %v565_v36 = vsel %vm528_vm8, %v1787_v30, -inf  ;;  %v1794_v37 = vadd.f32 %v509_v31, %v1718_v0 }
 0x254   :  { %563 = vmax.xlane.f32.xlu0 %v562_v34  ;;  %566 = vmax.xlane.f32.xlu1 %v565_v36  ;;  %v510_v38 = vsel %vm478_vm9, %v462_v27, %v494_v33  ;;  %v511_v40 = vsel %vm479_vm7, %v463_v26, %v495_v32 }
 0x255   :  { %v1797_v41 = vadd.f32 %v510_v38, %v1710_v51  ;;  %v568_v42 = vsel %vm528_vm8, %v1794_v37, -inf  ;;  %v1804_v45 = vadd.f32 %v511_v40, %v1718_v0 }
 0x257   :  { %v571_v43 = vsel %vm528_vm8, %v1797_v41, -inf  ;;  %v574_v46 = vsel %vm528_vm8, %v1804_v45, -inf }
 0x258   :  { %569 = vmax.xlane.f32.xlu0 %v568_v42  ;;  %572 = vmax.xlane.f32.xlu1 %v571_v43 }
 0x25c   :  { %575 = vmax.xlane.f32.xlu0 %v574_v46 }
 0x2c9   :  { %v531_v47 = vpop.xlane.xlu0 %530 }
 0x2ca   :  { %v577_v48 = vsub.f32 %v1715_v62, %v531_v47 }
 0x2cc   :  { %v593_v49 = vmul.f32 1.442695, %v577_v48 }
 0x2cd   :  { %v534_v50 = vpop.xlane.xlu1 %533  ;;  %v537_v52 = vpop.xlane.xlu0 %536 }
 0x2ce   :  { %1540 = vpow2.f32 %v593_v49  ;;  %v578_v53 = vsub.f32 %v1727_v16, %v534_v50  ;;  %v579_v55 = vsub.f32 %v1723_v8, %v537_v52 }
 0x2d0   :  { %v595_v56 = vmul.f32 1.442695, %v578_v53  ;;  %v597_v57 = vmul.f32 1.442695, %v579_v55 }
 0x2d1   :  { %v543_v58 = vpop.xlane.xlu1 %542  ;;  %v540_v60 = vpop.xlane.xlu0 %539 }
 0x2d2   :  { %1542 = vpow2.f32 %v595_v56  ;;  %v581_v61 = vsub.f32 %v1739_v29, %v543_v58  ;;  %v580_v63 = vsub.f32 %v1735_v24, %v540_v60 }
 0x2d3   :  { %1544 = vpow2.f32 %v597_v57 }
 0x2d4   :  { %v601_v1 = vmul.f32 1.442695, %v581_v61  ;;  %v599_v62 = vmul.f32 1.442695, %v580_v63 }
 0x2d5   :  { %v549_v2 = vpop.xlane.xlu1 %548  ;;  %v546_v5 = vpop.xlane.xlu0 %545 }
 0x2d6   :  { %1546 = vpow2.f32 %v601_v1  ;;  %v583_v6 = vsub.f32 %v1752_v44, %v549_v2  ;;  %v582_v16 = vsub.f32 %v1748_v39, %v546_v5 }
 0x2d7   :  { %1548 = vpow2.f32 %v599_v62 }
 0x2d8   :  { %v1815_v8 = vpop.eup %1540  ;;  %v605_v7 = vmul.f32 1.442695, %v583_v6  ;;  %v603_v10 = vmul.f32 1.442695, %v582_v16 }
 0x2d9   :  { %v555_v11 = vpop.xlane.xlu1 %554  ;;  %v552_v12 = vpop.xlane.xlu0 %551  ;;  %v625_v24 = vsel %vm528_vm8, %v1815_v8, 0.0 }
 0x2da   :  { %1550 = vpow2.f32 %v605_v7  ;;  %v585_v29 = vsub.f32 %v1764_v59, %v555_v11  ;;  %v584_v13 = vsub.f32 %v1760_v54, %v552_v12  ;;  %626 = vadd.xlane.f32.xlu1 %v625_v24 }
 0x2db   :  { %1552 = vpow2.f32 %v603_v10 }
 0x2dc   :  { %v1821_v44 = vpop.eup %1542  ;;  %v609_v39 = vmul.f32 1.442695, %v585_v29  ;;  %v607_v17 = vmul.f32 1.442695, %v584_v13 }
 0x2dd   :  { %v1823_v18 = vpop.eup %1544  ;;  %v561_v19 = vpop.xlane.xlu1 %560  ;;  %v628_v21 = vsel %vm528_vm8, %v1821_v44, 0.0 }
 0x2de   :  { %v558_v20 = vpop.xlane.xlu0 %557  ;;  %1554 = vpow2.f32 %v609_v39  ;;  %v587_v22 = vsub.f32 %v1776_v14, %v561_v19  ;;  %629 = vadd.xlane.f32.xlu0 %v628_v21  ;;  %v631_v54 = vsel %vm528_vm8, %v1823_v18, 0.0 }
 0x2df   :  { %v586_v59 = vsub.f32 %v1772_v9, %v558_v20  ;;  %1556 = vpow2.f32 %v607_v17  ;;  %632 = vadd.xlane.f32.xlu1 %v631_v54 }
 0x2e0   :  { %v1831_v23 = vpop.eup %1546  ;;  %v613_v26 = vmul.f32 1.442695, %v587_v22 }
 0x2e1   :  { %v611_v27 = vmul.f32 1.442695, %v586_v59  ;;  %v1833_v28 = vpop.eup %1548  ;;  %v567_v31 = vpop.xlane.xlu1 %566  ;;  %v637_v33 = vsel %vm528_vm8, %v1831_v23, 0.0 }
 0x2e2   :  { %v564_v32 = vpop.xlane.xlu0 %563  ;;  %1558 = vpow2.f32 %v613_v26  ;;  %v589_v9 = vsub.f32 %v1787_v30, %v567_v31  ;;  %v634_v34 = vsel %vm528_vm8, %v1833_v28, 0.0 }
 0x2e3   :  { %v588_v14 = vsub.f32 %v1784_v25, %v564_v32  ;;  %1560 = vpow2.f32 %v611_v27  ;;  %638 = vadd.xlane.f32.xlu1 %v637_v33  ;;  %635 = vadd.xlane.f32.xlu0 %v634_v34 }
 0x2e4   :  { %v1841_v36 = vpop.eup %1550  ;;  %v617_v38 = vmul.f32 1.442695, %v589_v9 }
 0x2e5   :  { %v615_v40 = vmul.f32 1.442695, %v588_v14  ;;  %v1843_v42 = vpop.eup %1552  ;;  %v573_v43 = vpop.xlane.xlu1 %572  ;;  %v643_v47 = vsel %vm528_vm8, %v1841_v36, 0.0 }
 0x2e6   :  { %v570_v46 = vpop.xlane.xlu0 %569  ;;  %1562 = vpow2.f32 %v617_v38  ;;  %v591_v25 = vsub.f32 %v1797_v41, %v573_v43  ;;  %v640_v48 = vsel %vm528_vm8, %v1843_v42, 0.0 }
 0x2e7   :  { %v590_v30 = vsub.f32 %v1794_v37, %v570_v46  ;;  %1564 = vpow2.f32 %v615_v40  ;;  %644 = vadd.xlane.f32.xlu1 %v643_v47  ;;  %641 = vadd.xlane.f32.xlu0 %v640_v48 }
 0x2e8   :  { %v1851_v49 = vpop.eup %1554  ;;  %v621_v50 = vmul.f32 1.442695, %v591_v25 }
 0x2e9   :  { %v619_v52 = vmul.f32 1.442695, %v590_v30  ;;  %v1853_v53 = vpop.eup %1556  ;;  %v649_v56 = vsel %vm528_vm8, %v1851_v49, 0.0 }
 0x2ea   :  { %v576_v55 = vpop.xlane.xlu0 %575  ;;  %1566 = vpow2.f32 %v621_v50  ;;  %v646_v37 = vsel %vm528_vm8, %v1853_v53, 0.0 }
 0x2eb   :  { %v592_v41 = vsub.f32 %v1804_v45, %v576_v55  ;;  %1568 = vpow2.f32 %v619_v52  ;;  %650 = vadd.xlane.f32.xlu1 %v649_v56  ;;  %647 = vadd.xlane.f32.xlu0 %v646_v37 }
 0x2ec   :  { %v1860_v57 = vpop.eup %1558 }
 0x2ed   :  { %v623_v58 = vmul.f32 1.442695, %v592_v41  ;;  %v1862_v60 = vpop.eup %1560  ;;  %v655_v61 = vsel %vm528_vm8, %v1860_v57, 0.0 }
 0x2ee   :  { %v652_v63 = vsel %vm528_vm8, %v1862_v60, 0.0 }
 0x2ef   :  { %1570 = vpow2.f32 %v623_v58  ;;  %656 = vadd.xlane.f32.xlu1 %v655_v61  ;;  %653 = vadd.xlane.f32.xlu0 %v652_v63 }
 0x2f0   :  { %v1868_v45 = vpop.eup %1562 }
 0x2f1   :  { %v1870_v1 = vpop.eup %1564  ;;  %v661_v62 = vsel %vm528_vm8, %v1868_v45, 0.0 }
 0x2f2   :  { %v658_v2 = vsel %vm528_vm8, %v1870_v1, 0.0 }
 0x2f3   :  { %662 = vadd.xlane.f32.xlu1 %v661_v62  ;;  %659 = vadd.xlane.f32.xlu0 %v658_v2  ;;  %v30_v2 = vld [vmem:[%s2012_s2 + $0x38] sm:$0xff] }
 0x2f4   :  { %v1876_v5 = vpop.eup %1566 }
 0x2f5   :  { %v1878_v6 = vpop.eup %1568  ;;  %v667_v16 = vsel %vm528_vm8, %v1876_v5, 0.0 }
 0x2f6   :  { %v664_v7 = vsel %vm528_vm8, %v1878_v6, 0.0 }
 0x2f7   :  { %668 = vadd.xlane.f32.xlu1 %v667_v16  ;;  %665 = vadd.xlane.f32.xlu0 %v664_v7  ;;  %v26_v16 = vld [vmem:[%s2012_s2 + $0x18] sm:$0xff] }
 0x2f8   :  { %v906_v7 = vrot.slane %v26_v16, %v1694_v35 }
 0x2f9   :  { %v1884_v10 = vpop.eup %1570 }
 0x2fa   :  { %v670_v11 = vsel %vm528_vm8, %v1884_v10, 0.0 }
 0x2fb   :  { %671 = vadd.xlane.f32.xlu0 %v670_v11  ;;  %v922_v11 = vrot.slane %v906_v7, %v1694_v35 }
 0x367   :  { %v627_v12 = vpop.xlane.xlu1 %626 }
 0x368   :  { %1572 = vrcp.f32 %v627_v12 }
 0x36b   :  { %v630_v24 = vpop.xlane.xlu0 %629 }
 0x36c   :  { %v633_v29 = vpop.xlane.xlu1 %632  ;;  %1574 = vrcp.f32 %v630_v24 }
 0x36d   :  { %1576 = vrcp.f32 %v633_v29  ;;  %v951_v29 = vrot.slane %v922_v11, %v1691_v15 }
 0x370   :  { %v639_v13 = vpop.xlane.xlu1 %638  ;;  %v636_v39 = vpop.xlane.xlu0 %635 }
 0x371   :  { %1578 = vrcp.f32 %v639_v13 }
 0x372   :  { %v1573_v17 = vpop.eup %1572  ;;  %1580 = vrcp.f32 %v636_v39 }
 0x373   :  { %v689_v19 = vmul.f32 %v1573_v17, %v1815_v8  ;;  %v944_v17 = vcombine.high %v922_v11, %v922_v11 }
 0x374   :  { %v645_v20 = vpop.xlane.xlu1 %644  ;;  %v642_v21 = vpop.xlane.xlu0 %641 }
 0x375   :  { %1582 = vrcp.f32 %v645_v20  ;;  %1454 = vmatprep.mubr.msk.f32.mxu1 %vm528_vm8, %v689_v19  ;;  %v899_v19 = vcombine.high %v26_v16, %v26_v16 }
 0x376   :  { %v1575_v22 = vpop.eup %1574  ;;  %1584 = vrcp.f32 %v642_v21 }
 0x377   :  { %v1577_v59 = vpop.eup %1576  ;;  %v690_v54 = vmul.f32 %v1575_v22, %v1821_v44 }
 0x378   :  { %v651_v26 = vpop.xlane.xlu1 %650  ;;  %v648_v27 = vpop.xlane.xlu0 %647  ;;  %v691_v31 = vmul.f32 %v1577_v59, %v1823_v18 }
 0x379   :  { %1586 = vrcp.f32 %v651_v26  ;;  %1455 = vmatmul.mubr.msk.f32.vlgmr.msra.gmra.mrb[2].mxu1 %vm528_vm8, %v690_v54  ;;  %v959_v26 = vrot.slane %v944_v17, %v1691_v15 }
 0x37a   :  { %1588 = vrcp.f32 %v648_v27  ;;  %1457 = vmatprep.mubr.msk.f32.mxu1 %vm528_vm8, %v691_v31  ;;  %v913_v27 = vrot.slane %v899_v19, %v1694_v35 }
 0x37b   :  { %v1579_v8 = vpop.eup %1578 }
 0x37c   :  { %v1581_v32 = vpop.eup %1580  ;;  %v657_v33 = vpop.xlane.xlu1 %656  ;;  %v693_v14 = vmul.f32 %v1579_v8, %v1831_v23 }
 0x37d   :  { %v654_v9 = vpop.xlane.xlu0 %653  ;;  %1590 = vrcp.f32 %v657_v33  ;;  %v692_v34 = vmul.f32 %v1581_v32, %v1833_v28 }
 0x37e   :  { %1592 = vrcp.f32 %v654_v9 }
 0x37f   :  { %v1583_v44 = vpop.eup %1582  ;;  %1458 = vmatmul.mubr.msk.f32.gmra.mrb[4].mxu1 %vm528_vm8, %v692_v34 }
 0x380   :  { %v1585_v18 = vpop.eup %1584  ;;  %1460 = vmatprep.mubr.msk.f32.mxu1 %vm528_vm8, %v693_v14  ;;  %v663_v38 = vpop.xlane.xlu1 %662  ;;  %v695_v43 = vmul.f32 %v1583_v44, %v1841_v36 }
 0x381   :  { %v660_v40 = vpop.xlane.xlu0 %659  ;;  %1594 = vrcp.f32 %v663_v38  ;;  %v694_v46 = vmul.f32 %v1585_v18, %v1843_v42 }
 0x382   :  { %1596 = vrcp.f32 %v660_v40 }
 0x383   :  { %v1587_v47 = vpop.eup %1586  ;;  %1461 = vmatmul.mubr.msk.f32.gmra.mrb[6].mxu1 %vm528_vm8, %v694_v46  ;;  %v915_v46 = vcombine.high %v913_v27, %v913_v27 }
 0x384   :  { %v1589_v23 = vpop.eup %1588  ;;  %1463 = vmatprep.mubr.msk.f32.mxu1 %vm528_vm8, %v695_v43  ;;  %v669_v28 = vpop.xlane.xlu1 %668  ;;  %v697_v30 = vmul.f32 %v1587_v47, %v1851_v49  ;;  %v929_v43 = vrot.slane %v913_v27, %v1694_v35 }
 0x385   :  { %v666_v25 = vpop.xlane.xlu0 %665  ;;  %1598 = vrcp.f32 %v669_v28  ;;  %v696_v48 = vmul.f32 %v1589_v23, %v1853_v53 }
 0x386   :  { %1600 = vrcp.f32 %v666_v25 }
 0x387   :  { %v1591_v50 = vpop.eup %1590  ;;  %1464 = vmatmul.mubr.msk.f32.gmra.mrb[8].mxu1 %vm528_vm8, %v696_v48 }
 0x388   :  { %v1593_v36 = vpop.eup %1592  ;;  %1466 = vmatprep.mubr.msk.f32.mxu1 %vm528_vm8, %v697_v30  ;;  %v699_v52 = vmul.f32 %v1591_v50, %v1860_v57 }
 0x389   :  { %v672_v42 = vpop.xlane.xlu0 %671  ;;  %v698_v55 = vmul.f32 %v1593_v36, %v1862_v60 }
 0x38a   :  { %1602 = vrcp.f32 %v672_v42  ;;  %v967_v42 = vrot.slane %v929_v43, %v1691_v15 }
 0x38b   :  { %v1595_v56 = vpop.eup %1594  ;;  %1467 = vmatmul.mubr.msk.f32.gmra.mrb[10].mxu1 %vm528_vm8, %v698_v55 }
 0x38c   :  { %v1597_v49 = vpop.eup %1596  ;;  %1469 = vmatprep.mubr.msk.f32.mxu1 %vm528_vm8, %v699_v52  ;;  %v701_v53 = vmul.f32 %v1595_v56, %v1868_v45  ;;  %v28_v45 = vld [vmem:[%s2012_s2 + $0x28] sm:$0xff]  ;;  %v943_v52 = vrot.slane %v915_v46, %v1694_v35  ;;  %v1384_v46 = vld [vmem:[%s2012_s2 + $0x50] ss:$0 sm:$0xff] }
 0x38d   :  { %v700_v41 = vmul.f32 %v1597_v49, %v1870_v1  ;;  %v29_v1 = vld [vmem:[%s2012_s2 + $0x30] sm:$0xff] }
 0x38e   :  { %v1515_v62 = vpack.c.bf16 %v29_v1, %v28_v45 }
 0x38f   :  { %v1599_v37 = vpop.eup %1598  ;;  %1470 = vmatmul.mubr.msk.f32.gmra.mrb[12].mxu1 %vm528_vm8, %v700_v41 }
 0x390   :  { %v1601_v58 = vpop.eup %1600  ;;  %1472 = vmatprep.mubr.msk.f32.mxu1 %vm528_vm8, %v701_v53  ;;  %v703_v57 = vmul.f32 %v1599_v37, %v1876_v5  ;;  %1516 = vmatprep.subr.bf16.mxu0 %v1515_v62  ;;  %v31_v5 = vld [vmem:[%s2012_s2 + $0x40] sm:$0xff] }
 0x391   :  { %v702_v60 = vmul.f32 %v1601_v58, %v1878_v6  ;;  %1518 = vmatpush3.bf16.msra.mxu0 %v1515_v62  ;;  %v1519_v6 = vpack.c.bf16 %v31_v5, %v30_v2 }
 0x393   :  { %1473 = vmatmul.mubr.msk.f32.gmra.mrb[14].mxu1 %vm528_vm8, %v702_v60  ;;  %1520 = vmatprep.subr.bf16.mxu0 %v1519_v6  ;;  %v971_v60 = vrot.slane %v943_v52, %v1691_v15 }
 0x394   :  { %v1603_v61 = vpop.eup %1602  ;;  %1475 = vmatprep.mubr.msk.f32.mxu1 %vm528_vm8, %v703_v57 }
 0x395   :  { %v704_v63 = vmul.f32 %v1603_v61, %v1884_v10  ;;  %1522 = vmatpush3.bf16.msra.mxu0 %v1519_v6  ;;  %v914_v10 = vcombine.high %v906_v7, %v906_v7  ;;  %v945_v61 = vcombine.high %v929_v43, %v929_v43  ;;  %v947_v7 = vcombine.high %v943_v52, %v943_v52 }
 0x396   :  { %1523 = vmatprep.subr.bf16.mxu0 %v1636_v3 }
 0x397   :  { %1476 = vmatmul.mubr.msk.f32.gmra.mrb[16].mxu1 %vm528_vm8, %v704_v63  ;;  %v936_v12 = vrot.slane %v914_v10, %v1694_v35  ;;  %v975_v16 = vrot.slane %v945_v61, %v1691_v15  ;;  %v979_v19 = vrot.slane %v947_v7, %v1691_v15 }
 0x399   :  { %v955_v39 = vrot.slane %v936_v12, %v1691_v15  ;;  %v946_v22 = vcombine.high %v936_v12, %v936_v12 }
 0x39b   :  { %v963_v44 = vrot.slane %v946_v22, %v1691_v15 }
 0x44c   :  { %v1456_v24 = vpop.f32.mrb[2].mxu1 }
 0x44d   :  { %v819_v13 = vpop.f32.mrb[3].mxu1  ;;  %v989_v3 = vmul.f32 %v1456_v24, %v951_v29 }
 0x44e   :  { %v988_v20 = vmul.f32 %v951_v29, %v819_v13 }
 0x44f   :  { %v1019_v8 = vsel %vm117_vm2, %v989_v3, 0.0 }
 0x450   :  { %v1004_v33 = vsel %vm117_vm2, %v988_v20, 0.0 }
 0x452   :  { %v1459_v21 = vpop.f32.mrb[4].mxu1 }
 0x453   :  { %v991_v59 = vmul.f32 %v1459_v21, %v955_v39  ;;  %v829_v54 = vpop.f32.mrb[5].mxu1 }
 0x454   :  { %v990_v31 = vmul.f32 %v955_v39, %v829_v54 }
 0x455   :  { %v1020_v32 = vsel %vm117_vm2, %v991_v59, 0.0 }
 0x456   :  { %v1021_v9 = vadd.f32 %v1020_v32, %v1019_v8  ;;  %v1005_v14 = vsel %vm117_vm2, %v990_v31, 0.0  ;;  %v1462_v34 = vpop.f32.mrb[6].mxu1  ;;  %v1381_v8 = vld [vmem:[%s2012_s2 + $0x20] ss:$0 sm:$0xff] }
 0x457   :  { %v1006_v18 = vadd.f32 %v1005_v14, %v1004_v33  ;;  %v993_v38 = vmul.f32 %v1462_v34, %v959_v26  ;;  %v839_v40 = vpop.f32.mrb[7].mxu1 }
 0x458   :  { %v992_v47 = vmul.f32 %v959_v26, %v839_v40 }
 0x459   :  { %v1022_v23 = vsel %vm117_vm2, %v993_v38, 0.0 }
 0x45a   :  { %v1023_v28 = vadd.f32 %v1022_v23, %v1021_v9  ;;  %v1007_v25 = vsel %vm117_vm2, %v992_v47, 0.0  ;;  %v1465_v30 = vpop.f32.mrb[8].mxu1 }
 0x45b   :  { %v1008_v48 = vadd.f32 %v1007_v25, %v1006_v18  ;;  %v995_v50 = vmul.f32 %v1465_v30, %v963_v44  ;;  %v849_v36 = vpop.f32.mrb[9].mxu1 }
 0x45c   :  { %v994_v55 = vmul.f32 %v963_v44, %v849_v36 }
 0x45d   :  { %v1024_v56 = vsel %vm117_vm2, %v995_v50, 0.0 }
 0x45e   :  { %v1025_v49 = vadd.f32 %v1024_v56, %v1023_v28  ;;  %v1009_v53 = vsel %vm117_vm2, %v994_v55, 0.0  ;;  %v1468_v41 = vpop.f32.mrb[10].mxu1 }
 0x45f   :  { %v1010_v37 = vadd.f32 %v1009_v53, %v1008_v48  ;;  %v997_v58 = vmul.f32 %v1468_v41, %v967_v42  ;;  %v859_v57 = vpop.f32.mrb[11].mxu1 }
 0x460   :  { %v996_v63 = vmul.f32 %v967_v42, %v859_v57 }
 0x461   :  { %v1026_v45 = vsel %vm117_vm2, %v997_v58, 0.0 }
 0x462   :  { %v1027_v1 = vadd.f32 %v1026_v45, %v1025_v49  ;;  %v1011_v62 = vsel %vm117_vm2, %v996_v63, 0.0  ;;  %v1471_v35 = vpop.f32.mrb[12].mxu1 }
 0x463   :  { %v1012_v2 = vadd.f32 %v1011_v62, %v1010_v37  ;;  %v999_v5 = vmul.f32 %v1471_v35, %v971_v60  ;;  %v869_v6 = vpop.f32.mrb[13].mxu1 }
 0x464   :  { %v998_v10 = vmul.f32 %v971_v60, %v869_v6 }
 0x465   :  { %v1028_v11 = vsel %vm117_vm2, %v999_v5, 0.0 }
 0x466   :  { %v1029_v12 = vadd.f32 %v1028_v11, %v1027_v1  ;;  %v1013_v24 = vsel %vm117_vm2, %v998_v10, 0.0  ;;  %v1474_v29 = vpop.f32.mrb[14].mxu1 }
 0x467   :  { %v1014_v13 = vadd.f32 %v1013_v24, %v1012_v2  ;;  %v1001_v39 = vmul.f32 %v1474_v29, %v975_v16  ;;  %v879_v17 = vpop.f32.mrb[15].mxu1 }
 0x468   :  { %v1000_v3 = vmul.f32 %v975_v16, %v879_v17 }
 0x469   :  { %v1030_v20 = vsel %vm117_vm2, %v1001_v39, 0.0 }
 0x46a   :  { %v1031_v21 = vadd.f32 %v1030_v20, %v1029_v12  ;;  %v1015_v22 = vsel %vm117_vm2, %v1000_v3, 0.0  ;;  %v1477_v59 = vpop.f32.mrb[16].mxu1 }
 0x46b   :  { %v1016_v54 = vadd.f32 %v1015_v22, %v1014_v13  ;;  %v1003_v26 = vmul.f32 %v1477_v59, %v979_v19  ;;  %v889_v27 = vpop.f32.mrb[17].mxu1  ;;  %v1388_v13 = vld [vmem:[%s2012_s2 + $0x58] ss:$0 sm:$0xff] }
 0x46c   :  { %v1002_v31 = vmul.f32 %v979_v19, %v889_v27 }
 0x46d   :  { %v1032_v32 = vsel %vm117_vm2, %v1003_v26, 0.0 }
 0x46e   :  { %v1033_v33 = vadd.f32 %v1032_v32, %v1031_v21  ;;  %v1017_v9 = vsel %vm117_vm2, %v1002_v31, 0.0 }
 0x46f   :  { %v1018_v14 = vadd.f32 %v1017_v9, %v1016_v54 }
 0x470   :  { %v1039_v34 = vadd.f32 %v1381_v8, %v1033_v33 }
 0x471   :  { %v1038_v44 = vadd.f32 %v1381_v8, %v1018_v14 }
 0x472   :  { %v1043_v18 = vmul.f32 0.01, %v1039_v34  ;;  %vm1041_vm11 = vcmp.ge.f32.partialorder %v1039_v34, 0.0 }
 0x473   :  { %vm1040_vm10 = vcmp.ge.f32.partialorder %v1038_v44, 0.0  ;;  %v1042_v38 = vmul.f32 0.01, %v1038_v44 }
 0x474   :  { %v1045_v43 = vsel %vm1041_vm11, %v1039_v34, %v1043_v18 }
 0x475   :  { %v1044_v40 = vsel %vm1040_vm10, %v1038_v44, %v1042_v38 }
 0x476   :  { %1486 = vmatprep.mubr.msk.f32.mxu0 %vm117_vm2, %v1044_v40 }
 0x477   :  { %1487 = vmatmul.mubr.msk.f32.vlgmr.msra.gmra.mrb[4].mxu0 %vm117_vm2, %v1045_v43 }
 0x478   :  { %1493 = vmatprep.mubr.msk.f32.mxu0 %vm1637_vm1, %v1638_v4  ;;  %v32_v4 = vld [vmem:[%s2012_s2 + $0x48] sm:$0x1] }
 0x54a   :  { %v1488_v47 = vpop.f32.mrb[4].mxu0 }
 0x54b   :  { %v1132_v23 = vmul.f32 %v1488_v47, %v1384_v46  ;;  %v1118_v28 = vpop.f32.mrb[5].mxu0 }
 0x54c   :  { %v1131_v25 = vmul.f32 %v1384_v46, %v1118_v28  ;;  %v1524_v30 = vpack.c.bf16 %v1488_v47, %v1118_v28 }
 0x54d   :  { %v1136_v48 = vsel %vm528_vm8, %v1132_v23, 0.0 }
 0x54e   :  { %1137 = vadd.xlane.f32.xlu0 %v1136_v48  ;;  %1526 = vmatpush3.bf16.xpose.msk.msra.mxu0 %vm1525_vm12, %v1524_v30  ;;  %v1133_v50 = vsel %vm528_vm8, %v1131_v25, 0.0 }
 0x54f   :  { %1528 = vmatprep.subr.bf16.mxu0 %v1524_v30  ;;  %1134 = vadd.xlane.f32.xlu1 %v1133_v50 }
 0x555   :  { %1494 = vmatmul.mubr.msk.f32.vlgmr.msra.gmra.mrb[6].mxu0 %vm528_vm8, %v32_v4 }
 0x556   :  { %1530 = vmatpush3.bf16.msra.mxu0 %v1524_v30 }
 0x5db   :  { %v1138_v55 = vpop.xlane.xlu0 %1137 }
 0x5dc   :  { %v1135_v56 = vpop.xlane.xlu1 %1134 }
 0x628   :  { %v1214_v36 = vpop.f32.mrb[6].mxu0 }
 0x629   :  { %v1221_v42 = vrot.slane %v1214_v36, %v1691_v15  ;;  %v1495_v52 = vpop.f32.mrb[7].mxu0 }
 0x62b   :  { %v1222_v49 = vadd.f32 %v1221_v42, %v1135_v56  ;;  %v1223_v53 = vadd.f32 %v1221_v42, %v1138_v55 }
 0x62d   :  { %v1226_v41 = vmul.f32 0.2, %v1222_v49  ;;  %v1227_v37 = vmul.f32 0.2, %v1223_v53  ;;  %vm1225_vm1 = vcmp.ge.f32.partialorder %v1223_v53, 0.0  ;;  %vm1224_vm2 = vcmp.ge.f32.partialorder %v1222_v49, 0.0 }
 0x62f   :  { %v1229_v58 = vsel %vm1225_vm1, %v1223_v53, %v1227_v37  ;;  %v1228_v57 = vsel %vm1224_vm2, %v1222_v49, %v1226_v41 }
 0x630   :  { %v1231_v60 = vadd.f32 %v1229_v58, %v1718_v0  ;;  %v1230_v61 = vadd.f32 %v1228_v57, %v1710_v51 }
 0x632   :  { %v1235_v63 = vsel %vm528_vm8, %v1231_v60, -inf  ;;  %v1232_v45 = vsel %vm528_vm8, %v1230_v61, -inf }
 0x633   :  { %1236 = vmax.xlane.f32.xlu0 %v1235_v63  ;;  %1233 = vmax.xlane.f32.xlu1 %v1232_v45 }
 0x6c0   :  { %v1237_v15 = vpop.xlane.xlu0 %1236  ;;  %v1234_v1 = vpop.xlane.xlu1 %1233 }
 0x6c1   :  { %v1239_v62 = vsub.f32 %v1231_v60, %v1237_v15  ;;  %v1238_v35 = vsub.f32 %v1230_v61, %v1234_v1 }
 0x6c3   :  { %v1242_v2 = vmul.f32 1.442695, %v1239_v62  ;;  %v1240_v5 = vmul.f32 1.442695, %v1238_v35 }
 0x6c5   :  { %1604 = vpow2.f32 %v1242_v2 }
 0x6c6   :  { %1606 = vpow2.f32 %v1240_v5 }
 0x6cf   :  { %v1605_v6 = vpop.eup %1604 }
 0x6d0   :  { %v1607_v16 = vpop.eup %1606  ;;  %v1247_v0 = vsel %vm528_vm8, %v1605_v6, 0.0 }
 0x6d1   :  { %1248 = vadd.xlane.f32.xlu0 %v1247_v0  ;;  %v1244_v51 = vsel %vm528_vm8, %v1607_v16, 0.0 }
 0x6d2   :  { %1245 = vadd.xlane.f32.xlu1 %v1244_v51 }
 0x75e   :  { %v1249_v7 = vpop.xlane.xlu0 %1248 }
 0x75f   :  { %1608 = vrcp.f32 %v1249_v7  ;;  %v1246_v10 = vpop.xlane.xlu1 %1245 }
 0x760   :  { %1610 = vrcp.f32 %v1246_v10 }
 0x769   :  { %v1609_v11 = vpop.eup %1608 }
 0x76a   :  { %v1611_v12 = vpop.eup %1610  ;;  %v1253_v24 = vmul.f32 %v1609_v11, %v1605_v6 }
 0x76b   :  { %v1252_v29 = vmul.f32 %v1611_v12, %v1607_v16 }
 0x76d   :  { %1500 = vmatprep.mubr.msk.f32.mxu0 %vm528_vm8, %v1252_v29 }
 0x76e   :  { %1501 = vmatmul.mubr.msk.f32.vlgmr.msra.gmra.mrb[8].mxu0 %vm528_vm8, %v1253_v24 }
 0x841   :  { %v1502_v39 = vpop.f32.mrb[8].mxu0 }
 0x842   :  { %v1336_v17 = vadd.f32 %v1502_v39, %v1388_v13  ;;  %v1330_v19 = vpop.f32.mrb[9].mxu0 }
 0x843   :  { %v1331_v3 = vadd.f32 %v1388_v13, %v1330_v19 }
 0x844   :  { %1340 = vst.msk [vmem:[#allocation2 + $0x8] sm:$0xff] %vm528_vm8, %v1336_v17 }
 0x845   :  { %1339 = vst.msk [vmem:[#allocation2] sm:$0xff] %vm528_vm8, %v1331_v3 }
 0x846   :  { %1623 = shalt.err (!%p1620_p4)
}
 0x847   :  { %s1624_s18 = scalar_lea.hbm %s2013_s3, 256 }
 0x848   :  { %p1625_p5 = scmp.ne.s32.totalorder %s2013_s3, %s1624_s18  ;;  %p1628_p6 = scmp.lt.u32.totalorder %s1624_s18, %s2013_s3 }
 0x84a   :  { %p1630_p7 = pnand %p1628_p6, %p1625_p5 }
 0x84c   :  { %1633 = shalt.err (!%p1630_p7)
}
 0x84d   :  { %s1642_s23 = smov 128   ;;  %s1643_s24 = smov 8  }
 0x84e   :  { %1352 = dma.vmem_to_hbm [thread:$0]  %s1347_s16, 256, %s2013_s3, [#allocation3], %s1642_s23, %s1642_s23, %s1643_s24  }
 0x84f   :  { %1634 = dma.done.wait [#allocation3], 256  }
 0x850   :  { %1635 = vsyncadd [#allocation3], 4294967040 }
 0x851   :  { %1356 = vsyncpa [#allocation3], 1 }

</bundles_post_ra>
